<compile_context>
chip_gen: v7x
topology: tpu7x:2x2x1
jax: 0.10.0
libtpu: 0.0.40
codegen_flags: <defaults>
</compile_context>

<pallas_src>
import jax
import jax.numpy as jnp
from jax import lax
from jax.experimental import pallas as pl
from jax.experimental.pallas import tpu as pltpu


def _round_up(v, m):
    return ((v + m - 1) // m) * m


def block_kernel(x_ref, w1_ref, t1_ref, w2_ref, t2_ref, w3_ref, t3_ref,
                 wsc_ref, bsc_ref, o_ref):
    _, H, W, Cin = x_ref.shape
    C = w1_ref.shape[1]
    Cout = w3_ref.shape[1]
    Wp = _round_up(W + 2, 8)            # sublane-aligned padded width

    x = x_ref[0].reshape(H * W, Cin)    # bf16 (HW, Cin)

    # conv1 (1x1, BN scale folded into weights) + shift + ReLU
    h1 = jnp.dot(x, w1_ref[...], preferred_element_type=jnp.float32)
    h1 = jnp.maximum(h1 + t1_ref[...], 0.0)
    h1b = h1.astype(jnp.bfloat16)

    # conv2 (3x3, padding=1) as a single im2col matmul with K = 9*C.
    # Pad to (H+3, Wp, C) and flatten: each tap (dh, dw) is the static slice
    # pf[dh*Wp + dw : dh*Wp + dw + H*Wp].  Rows with w >= W are garbage and
    # are discarded after the matmul.
    pad = jnp.pad(h1b.reshape(H, W, C), ((1, 2), (1, Wp - W - 1), (0, 0)))
    pf = pad.reshape((H + 3) * Wp, C)
    M2 = H * Wp
    cols = [pf[dh * Wp + dw: dh * Wp + dw + M2, :]
            for dh in range(3) for dw in range(3)]
    im2col = jnp.concatenate(cols, axis=1)                    # (M2, 9*C) bf16
    h2 = jnp.dot(im2col, w2_ref[...], preferred_element_type=jnp.float32)
    h2 = jnp.maximum(h2 + t2_ref[...], 0.0)
    h2 = h2.reshape(H, Wp, C)[:, :W, :].reshape(H * W, C)     # drop pad cols
    h2b = h2.astype(jnp.bfloat16)

    # conv3 (1x1, BN scale folded) + shift
    h3 = jnp.dot(h2b, w3_ref[...], preferred_element_type=jnp.float32)
    h3 = h3 + t3_ref[...]

    # projection shortcut (1x1 conv + bias), residual add, ReLU
    sc = jnp.dot(x, wsc_ref[...], preferred_element_type=jnp.float32)
    sc = sc + bsc_ref[...]
    y = jnp.maximum(h3 + sc, 0.0)
    o_ref[0] = y.reshape(H, W, Cout)


def block_forward(x_nhwc, params):
    """x_nhwc: (N, H, W, Cin) float32. Returns (N, H, W, Cout) float32."""
    N, H, W, Cin = x_nhwc.shape
    w1, t1, w2f, t2, w3, t3, wsc, bsc = params
    Cout = w3.shape[1]
    x_bf = x_nhwc.astype(jnp.bfloat16)   # halve activation DMA traffic

    def full_spec(shape):
        return pl.BlockSpec(shape, lambda n, _nd=len(shape): (0,) * _nd)

    return pl.pallas_call(
        block_kernel,
        out_shape=jax.ShapeDtypeStruct((N, H, W, Cout), jnp.float32),
        grid_spec=pltpu.PrefetchScalarGridSpec(
            num_scalar_prefetch=0,
            grid=(N,),
            in_specs=[
                pl.BlockSpec((1, H, W, Cin), lambda n: (n, 0, 0, 0)),
                full_spec(w1.shape), full_spec(t1.shape),
                full_spec(w2f.shape), full_spec(t2.shape),
                full_spec(w3.shape), full_spec(t3.shape),
                full_spec(wsc.shape), full_spec(bsc.shape),
            ],
            out_specs=pl.BlockSpec((1, H, W, Cout), lambda n: (n, 0, 0, 0)),
        ),
        compiler_params=pltpu.CompilerParams(
            dimension_semantics=("parallel",)),
    )(x_bf, w1, t1, w2f, t2, w3, t3, wsc, bsc)


def make_params(key, cin, cout):
    """Deterministic synthetic params.  Conv bias + inference BN are folded:
    BN scale is multiplied into the conv weights (then cast to bf16), and only
    the per-channel shift is applied in-kernel."""
    c = cout // 4
    eps = 1e-5
    ks = list(jax.random.split(key, 20))

    def u(k, shape, scale=0.1):
        return jax.random.uniform(k, shape, jnp.float32, -1.0, 1.0) * scale

    def bn_fold(kg, kb, km, kv, bias, ch):
        gamma = 1.0 + u(kg, (ch,), 0.3)
        beta = u(kb, (ch,), 0.3)
        mean = u(km, (ch,), 0.3)
        var = jax.random.uniform(kv, (ch,), jnp.float32, 0.5, 1.5)
        scale = gamma / jnp.sqrt(var + eps)
        shift = beta + (bias - mean) * scale
        return scale, shift

    # conv1: 1x1, cin -> c
    w1 = u(ks[0], (cin, c))
    b1 = u(ks[1], (c,))
    s1, t1 = bn_fold(ks[2], ks[3], ks[4], ks[5], b1, c)
    # conv2: 3x3, c -> c (HWIO)
    w2 = u(ks[6], (3, 3, c, c))
    b2 = u(ks[7], (c,))
    s2, t2 = bn_fold(ks[8], ks[9], ks[10], ks[11], b2, c)
    # conv3: 1x1, c -> cout
    w3 = u(ks[12], (c, cout))
    b3 = u(ks[13], (cout,))
    s3, t3 = bn_fold(ks[14], ks[15], ks[16], ks[17], b3, cout)
    # projection shortcut: 1x1, cin -> cout (bias, no BN)
    wsc = u(ks[18], (cin, cout))
    bsc = u(ks[19], (cout,))

    # Fold BN scale into weights, cast weights to bf16 for the MXU.
    w1s = (w1 * s1[None, :]).astype(jnp.bfloat16)
    w2s = (w2 * s2[None, None, None, :]).astype(jnp.bfloat16)
    w3s = (w3 * s3[None, :]).astype(jnp.bfloat16)
    wscb = wsc.astype(jnp.bfloat16)

    kernel_params = (
        w1s, t1.reshape(1, c),
        w2s.reshape(9 * c, c), t2.reshape(1, c),     # row block k = tap (k//3, k%3)
        w3s, t3.reshape(1, cout),
        wscb, bsc.reshape(1, cout),
    )
    # f32 copies of the SAME bf16-rounded weights for the reference check.
    ref_params = (
        w1s.astype(jnp.float32), t1.reshape(1, c),
        w2s.astype(jnp.float32), t2.reshape(1, c),
        w3s.astype(jnp.float32), t3.reshape(1, cout),
        wscb.astype(jnp.float32), bsc.reshape(1, cout),
    )
    return kernel_params, ref_params


def block_reference(x_nhwc, ref_params):
    """Pure-JAX f32 reference (same folded-BN math) for validation."""
    w1, t1, w2, t2, w3, t3, wsc, bsc = ref_params
    h = jnp.maximum(jnp.einsum('nhwi,io->nhwo', x_nhwc, w1) + t1, 0.0)
    h = lax.conv_general_dilated(h, w2, (1, 1), 'SAME',
                                 dimension_numbers=('NHWC', 'HWIO', 'NHWC'))
    h = jnp.maximum(h + t2, 0.0)
    h = jnp.einsum('nhwi,io->nhwo', h, w3) + t3
    sc = jnp.einsum('nhwi,io->nhwo', x_nhwc, wsc) + bsc
    return jnp.maximum(h + sc, 0.0)


if __name__ == "__main__":
    # Small shapes consistent with Block(channel_in, channel_out): channel = channel_out // 4
    N, Cin, Cout, H, W = 2, 32, 128, 8, 8

    key = jax.random.PRNGKey(0)
    kx, kp = jax.random.split(key)
    x_nchw = jax.random.normal(kx, (N, Cin, H, W), jnp.float32)   # PyTorch-style input
    x_nhwc = jnp.transpose(x_nchw, (0, 2, 3, 1))                  # kernel layout

    kernel_params, ref_params = make_params(kp, Cin, Cout)

    out = block_forward(x_nhwc, kernel_params)
    out = jax.block_until_ready(out)

    # Reference sees the same bf16-rounded activations/weights (in f32).
    x_ref_in = x_nhwc.astype(jnp.bfloat16).astype(jnp.float32)
    ref = block_reference(x_ref_in, ref_params)

    assert out.shape == (N, H, W, Cout)
    max_diff = float(jnp.max(jnp.abs(out - ref)))
    assert bool(jnp.allclose(out, ref, atol=3e-2, rtol=3e-2)), \
        f"max abs diff {max_diff}"

    print("KERNEL_OK")
</pallas_src>

<mosaic_0001>
module attributes {stable_mosaic.version = 11 : i64} {
  func.func @block_kernel(%arg0: i32, %arg1: memref<1x8x8x32xbf16, #tpu.memory_space<vmem>>, %arg2: memref<32x32xbf16, #tpu.memory_space<vmem>>, %arg3: memref<1x32xf32, #tpu.memory_space<vmem>>, %arg4: memref<288x32xbf16, #tpu.memory_space<vmem>>, %arg5: memref<1x32xf32, #tpu.memory_space<vmem>>, %arg6: memref<32x128xbf16, #tpu.memory_space<vmem>>, %arg7: memref<1x128xf32, #tpu.memory_space<vmem>>, %arg8: memref<32x128xbf16, #tpu.memory_space<vmem>>, %arg9: memref<1x128xf32, #tpu.memory_space<vmem>>, %arg10: memref<1x8x8x128xf32, #tpu.memory_space<vmem>>) attributes {dimension_semantics = [#tpu.dimension_semantics<parallel>], iteration_bounds = array<i64: 2>, scalar_prefetch = 0 : i64, scratch_operands = 0 : i64, tpu.core_type = #tpu.core_type<tc>, window_params = [{transform_indices = @transform_0, window_bounds = array<i64: 1, 8, 8, 32>}, {pipeline_mode = #tpu.pipeline_mode<synchronous>, transform_indices = @transform_1, window_bounds = array<i64: 32, 32>}, {pipeline_mode = #tpu.pipeline_mode<synchronous>, transform_indices = @transform_2, window_bounds = array<i64: 1, 32>}, {pipeline_mode = #tpu.pipeline_mode<synchronous>, transform_indices = @transform_3, window_bounds = array<i64: 288, 32>}, {pipeline_mode = #tpu.pipeline_mode<synchronous>, transform_indices = @transform_4, window_bounds = array<i64: 1, 32>}, {pipeline_mode = #tpu.pipeline_mode<synchronous>, transform_indices = @transform_5, window_bounds = array<i64: 32, 128>}, {pipeline_mode = #tpu.pipeline_mode<synchronous>, transform_indices = @transform_6, window_bounds = array<i64: 1, 128>}, {pipeline_mode = #tpu.pipeline_mode<synchronous>, transform_indices = @transform_7, window_bounds = array<i64: 32, 128>}, {pipeline_mode = #tpu.pipeline_mode<synchronous>, transform_indices = @transform_8, window_bounds = array<i64: 1, 128>}, {transform_indices = @transform_9, window_bounds = array<i64: 1, 8, 8, 128>}]} {
    %c0 = arith.constant 0 : index
    %c0_0 = arith.constant 0 : index
    %c0_1 = arith.constant 0 : index
    %c0_2 = arith.constant 0 : index
    %0 = vector.load %arg1[%c0, %c0_0, %c0_1, %c0_2] : memref<1x8x8x32xbf16, #tpu.memory_space<vmem>>, vector<1x8x8x32xbf16>
    %1 = vector.shape_cast %0 : vector<1x8x8x32xbf16> to vector<8x8x32xbf16>
    %2 = vector.shape_cast %1 : vector<8x8x32xbf16> to vector<64x32xbf16>
    %c0_3 = arith.constant 0 : index
    %c0_4 = arith.constant 0 : index
    %3 = vector.load %arg2[%c0_3, %c0_4] : memref<32x32xbf16, #tpu.memory_space<vmem>>, vector<32x32xbf16>
    %cst = arith.constant dense<0.000000e+00> : vector<64x32xf32>
    %4 = tpu.matmul %2, %3, %cst {dimension_numbers = #tpu.dot_dimension_numbers<[1], [0], [0], [1], [0, 0, 1, 1], [], []>} : vector<64x32xbf16>, vector<32x32xbf16>, vector<64x32xf32> -> vector<64x32xf32>
    %c0_5 = arith.constant 0 : index
    %c0_6 = arith.constant 0 : index
    %5 = vector.load %arg3[%c0_5, %c0_6] : memref<1x32xf32, #tpu.memory_space<vmem>>, vector<1x32xf32>
    %6 = vector.broadcast %5 : vector<1x32xf32> to vector<64x32xf32>
    %7 = arith.addf %4, %6 : vector<64x32xf32>
    %cst_7 = arith.constant 0.000000e+00 : f32
    %8 = vector.broadcast %cst_7 : f32 to vector<64x32xf32>
    %9 = arith.maximumf %7, %8 : vector<64x32xf32>
    %10 = arith.truncf %9 : vector<64x32xf32> to vector<64x32xbf16>
    %11 = vector.shape_cast %10 : vector<64x32xbf16> to vector<8x8x32xbf16>
    %c0_i32 = arith.constant 0 : i32
    %12 = arith.sitofp %c0_i32 : i32 to bf16
    %13 = vector.broadcast %12 : bf16 to vector<1x8x32xbf16>
    %14 = tpu.concatenate %13, %11 in 0 : vector<1x8x32xbf16>, vector<8x8x32xbf16> -> vector<9x8x32xbf16>
    %15 = vector.broadcast %12 : bf16 to vector<2x8x32xbf16>
    %16 = tpu.concatenate %14, %15 in 0 : vector<9x8x32xbf16>, vector<2x8x32xbf16> -> vector<11x8x32xbf16>
    %17 = vector.broadcast %12 : bf16 to vector<11x1x32xbf16>
    %18 = tpu.concatenate %17, %16 in 1 : vector<11x1x32xbf16>, vector<11x8x32xbf16> -> vector<11x9x32xbf16>
    %19 = vector.broadcast %12 : bf16 to vector<11x7x32xbf16>
    %20 = tpu.concatenate %18, %19 in 1 : vector<11x9x32xbf16>, vector<11x7x32xbf16> -> vector<11x16x32xbf16>
    %21 = vector.shape_cast %20 : vector<11x16x32xbf16> to vector<176x32xbf16>
    %22 = vector.extract_strided_slice %21 {offsets = [0, 0], sizes = [128, 32], strides = [1, 1]} : vector<176x32xbf16> to vector<128x32xbf16>
    %23 = vector.extract_strided_slice %21 {offsets = [1, 0], sizes = [128, 32], strides = [1, 1]} : vector<176x32xbf16> to vector<128x32xbf16>
    %24 = vector.extract_strided_slice %21 {offsets = [2, 0], sizes = [128, 32], strides = [1, 1]} : vector<176x32xbf16> to vector<128x32xbf16>
    %25 = vector.extract_strided_slice %21 {offsets = [16, 0], sizes = [128, 32], strides = [1, 1]} : vector<176x32xbf16> to vector<128x32xbf16>
    %26 = vector.extract_strided_slice %21 {offsets = [17, 0], sizes = [128, 32], strides = [1, 1]} : vector<176x32xbf16> to vector<128x32xbf16>
    %27 = vector.extract_strided_slice %21 {offsets = [18, 0], sizes = [128, 32], strides = [1, 1]} : vector<176x32xbf16> to vector<128x32xbf16>
    %28 = vector.extract_strided_slice %21 {offsets = [32, 0], sizes = [128, 32], strides = [1, 1]} : vector<176x32xbf16> to vector<128x32xbf16>
    %29 = vector.extract_strided_slice %21 {offsets = [33, 0], sizes = [128, 32], strides = [1, 1]} : vector<176x32xbf16> to vector<128x32xbf16>
    %30 = vector.extract_strided_slice %21 {offsets = [34, 0], sizes = [128, 32], strides = [1, 1]} : vector<176x32xbf16> to vector<128x32xbf16>
    %31 = tpu.concatenate %22, %23, %24, %25, %26, %27, %28, %29, %30 in 1 : vector<128x32xbf16>, vector<128x32xbf16>, vector<128x32xbf16>, vector<128x32xbf16>, vector<128x32xbf16>, vector<128x32xbf16>, vector<128x32xbf16>, vector<128x32xbf16>, vector<128x32xbf16> -> vector<128x288xbf16>
    %c0_8 = arith.constant 0 : index
    %c0_9 = arith.constant 0 : index
    %32 = vector.load %arg4[%c0_8, %c0_9] : memref<288x32xbf16, #tpu.memory_space<vmem>>, vector<288x32xbf16>
    %cst_10 = arith.constant dense<0.000000e+00> : vector<128x32xf32>
    %33 = tpu.matmul %31, %32, %cst_10 {dimension_numbers = #tpu.dot_dimension_numbers<[1], [0], [0], [1], [0, 0, 1, 1], [], []>} : vector<128x288xbf16>, vector<288x32xbf16>, vector<128x32xf32> -> vector<128x32xf32>
    %c0_11 = arith.constant 0 : index
    %c0_12 = arith.constant 0 : index
    %34 = vector.load %arg5[%c0_11, %c0_12] : memref<1x32xf32, #tpu.memory_space<vmem>>, vector<1x32xf32>
    %35 = vector.broadcast %34 : vector<1x32xf32> to vector<128x32xf32>
    %36 = arith.addf %33, %35 : vector<128x32xf32>
    %cst_13 = arith.constant 0.000000e+00 : f32
    %37 = vector.broadcast %cst_13 : f32 to vector<128x32xf32>
    %38 = arith.maximumf %36, %37 : vector<128x32xf32>
    %39 = vector.shape_cast %38 : vector<128x32xf32> to vector<8x16x32xf32>
    %40 = vector.extract_strided_slice %39 {offsets = [0, 0, 0], sizes = [8, 8, 32], strides = [1, 1, 1]} : vector<8x16x32xf32> to vector<8x8x32xf32>
    %41 = vector.shape_cast %40 : vector<8x8x32xf32> to vector<64x32xf32>
    %42 = arith.truncf %41 : vector<64x32xf32> to vector<64x32xbf16>
    %c0_14 = arith.constant 0 : index
    %c0_15 = arith.constant 0 : index
    %43 = vector.load %arg6[%c0_14, %c0_15] : memref<32x128xbf16, #tpu.memory_space<vmem>>, vector<32x128xbf16>
    %cst_16 = arith.constant dense<0.000000e+00> : vector<64x128xf32>
    %44 = tpu.matmul %42, %43, %cst_16 {dimension_numbers = #tpu.dot_dimension_numbers<[1], [0], [0], [1], [0, 0, 1, 1], [], []>} : vector<64x32xbf16>, vector<32x128xbf16>, vector<64x128xf32> -> vector<64x128xf32>
    %c0_17 = arith.constant 0 : index
    %c0_18 = arith.constant 0 : index
    %45 = vector.load %arg7[%c0_17, %c0_18] : memref<1x128xf32, #tpu.memory_space<vmem>>, vector<1x128xf32>
    %46 = vector.broadcast %45 : vector<1x128xf32> to vector<64x128xf32>
    %47 = arith.addf %44, %46 : vector<64x128xf32>
    %c0_19 = arith.constant 0 : index
    %c0_20 = arith.constant 0 : index
    %48 = vector.load %arg8[%c0_19, %c0_20] : memref<32x128xbf16, #tpu.memory_space<vmem>>, vector<32x128xbf16>
    %cst_21 = arith.constant dense<0.000000e+00> : vector<64x128xf32>
    %49 = tpu.matmul %2, %48, %cst_21 {dimension_numbers = #tpu.dot_dimension_numbers<[1], [0], [0], [1], [0, 0, 1, 1], [], []>} : vector<64x32xbf16>, vector<32x128xbf16>, vector<64x128xf32> -> vector<64x128xf32>
    %c0_22 = arith.constant 0 : index
    %c0_23 = arith.constant 0 : index
    %50 = vector.load %arg9[%c0_22, %c0_23] : memref<1x128xf32, #tpu.memory_space<vmem>>, vector<1x128xf32>
    %51 = vector.broadcast %50 : vector<1x128xf32> to vector<64x128xf32>
    %52 = arith.addf %49, %51 : vector<64x128xf32>
    %53 = arith.addf %47, %52 : vector<64x128xf32>
    %cst_24 = arith.constant 0.000000e+00 : f32
    %54 = vector.broadcast %cst_24 : f32 to vector<64x128xf32>
    %55 = arith.maximumf %53, %54 : vector<64x128xf32>
    %56 = vector.shape_cast %55 : vector<64x128xf32> to vector<8x8x128xf32>
    %c0_25 = arith.constant 0 : index
    %c0_26 = arith.constant 0 : index
    %c0_27 = arith.constant 0 : index
    %c0_28 = arith.constant 0 : index
    %57 = vector.load %arg10[%c0_25, %c0_26, %c0_27, %c0_28] : memref<1x8x8x128xf32, #tpu.memory_space<vmem>>, vector<1x8x8x128xf32>
    %58 = vector.shape_cast %57 : vector<1x8x8x128xf32> to vector<8x8x128xf32>
    %59 = vector.shape_cast %56 : vector<8x8x128xf32> to vector<1x8x8x128xf32>
    tpu.vector_store %arg10[%c0_25, %c0_26, %c0_27, %c0_28], %59 {strides = array<i32>} : memref<1x8x8x128xf32, #tpu.memory_space<vmem>>, vector<1x8x8x128xf32>,
    return
  }
  func.func @transform_0(%arg0: i32) -> (i32, i32, i32, i32) {
    %c0_i32 = arith.constant 0 : i32
    %c0_i32_0 = arith.constant 0 : i32
    %c0_i32_1 = arith.constant 0 : i32
    %c0_i32_2 = arith.constant 0 : i32
    return %arg0, %c0_i32, %c0_i32_0, %c0_i32_1 : i32, i32, i32, i32
  }
  func.func @transform_1(%arg0: i32) -> (i32, i32) {
    %c0_i32 = arith.constant 0 : i32
    %c0_i32_0 = arith.constant 0 : i32
    %c0_i32_1 = arith.constant 0 : i32
    return %c0_i32, %c0_i32_0 : i32, i32
  }
  func.func @transform_2(%arg0: i32) -> (i32, i32) {
    %c0_i32 = arith.constant 0 : i32
    %c0_i32_0 = arith.constant 0 : i32
    %c0_i32_1 = arith.constant 0 : i32
    return %c0_i32, %c0_i32_0 : i32, i32
  }
  func.func @transform_3(%arg0: i32) -> (i32, i32) {
    %c0_i32 = arith.constant 0 : i32
    %c0_i32_0 = arith.constant 0 : i32
    %c0_i32_1 = arith.constant 0 : i32
    return %c0_i32, %c0_i32_0 : i32, i32
  }
  func.func @transform_4(%arg0: i32) -> (i32, i32) {
    %c0_i32 = arith.constant 0 : i32
    %c0_i32_0 = arith.constant 0 : i32
    %c0_i32_1 = arith.constant 0 : i32
    return %c0_i32, %c0_i32_0 : i32, i32
  }
  func.func @transform_5(%arg0: i32) -> (i32, i32) {
    %c0_i32 = arith.constant 0 : i32
    %c0_i32_0 = arith.constant 0 : i32
    %c0_i32_1 = arith.constant 0 : i32
    return %c0_i32, %c0_i32_0 : i32, i32
  }
  func.func @transform_6(%arg0: i32) -> (i32, i32) {
    %c0_i32 = arith.constant 0 : i32
    %c0_i32_0 = arith.constant 0 : i32
    %c0_i32_1 = arith.constant 0 : i32
    return %c0_i32, %c0_i32_0 : i32, i32
  }
  func.func @transform_7(%arg0: i32) -> (i32, i32) {
    %c0_i32 = arith.constant 0 : i32
    %c0_i32_0 = arith.constant 0 : i32
    %c0_i32_1 = arith.constant 0 : i32
    return %c0_i32, %c0_i32_0 : i32, i32
  }
  func.func @transform_8(%arg0: i32) -> (i32, i32) {
    %c0_i32 = arith.constant 0 : i32
    %c0_i32_0 = arith.constant 0 : i32
    %c0_i32_1 = arith.constant 0 : i32
    return %c0_i32, %c0_i32_0 : i32, i32
  }
  func.func @transform_9(%arg0: i32) -> (i32, i32, i32, i32) {
    %c0_i32 = arith.constant 0 : i32
    %c0_i32_0 = arith.constant 0 : i32
    %c0_i32_1 = arith.constant 0 : i32
    %c0_i32_2 = arith.constant 0 : i32
    return %arg0, %c0_i32, %c0_i32_0, %c0_i32_1 : i32, i32, i32, i32
  }
}

</mosaic_0001>

<bundles_post_ra>
// kernel: tpu_custom_call.1
= control target key start
LH: loop header
LB: loop body
LE: loop exit
PB: predicated region body
PF: predicated region fallthrough
CT: control target
= control target key end

     0   :  { %14 = vsyncpa [#allocation3], 0  ;;  %s2567_s0 = inlined_call_operand.vmem [shape: bf16[2,8,8,32], index: 0, kind: input, shape index: {}]   ;;  %s2568_s1 = inlined_call_operand.vmem [shape: bf16[32,32], index: 1, kind: input, shape index: {}]   ;;  %s2569_s2 = inlined_call_operand.vmem [shape: f32[1,32], index: 2, kind: input, shape index: {}]   ;;  %s2570_s3 = inlined_call_operand.vmem [shape: bf16[288,32], index: 3, kind: input, shape index: {}]   ;;  %s2571_s4 = inlined_call_operand.vmem [shape: f32[1,32], index: 4, kind: input, shape index: {}]   ;;  %s2572_s5 = inlined_call_operand.vmem [shape: bf16[32,128], index: 5, kind: input, shape index: {}]   ;;  %s2573_s6 = inlined_call_operand.vmem [shape: f32[1,128], index: 6, kind: input, shape index: {}]   ;;  %s2574_s7 = inlined_call_operand.vmem [shape: bf16[32,128], index: 7, kind: input, shape index: {}]   ;;  %s2575_s8 = inlined_call_operand.vmem [shape: f32[1,128], index: 8, kind: input, shape index: {}]   ;;  %s2576_s9 = inlined_call_operand.hbm [shape: f32[2,8,8,128], index: 9, kind: output, shape index: {}]  }
   0x1   :  { %16 = vsyncpa [#allocation3 + $0x1], 0  ;;  %s2014_s30 = smov 0   ;;  %s2016_s10 = smov 0  }
   0x2   :  { %s2018_s11 = smov 0   ;;  %s2020_s12 = smov 0  }
   0x3 LB: > { %s2035_s13 = sadd.s32 4294967295, %s1955_s12   ;;  %s1563_s14 = sadd.s32 4294967294, %s1955_s12   ;;  %s1955_s12 = sphi %s2020_s12, %s2586_s12   ;;  %s1951_s11 = sphi %s2018_s11, %s2585_s11   ;;  %s1947_s10 = sphi %s2016_s10, %s2584_s10   ;;  %s1943_s30 = sphi %s2014_s30, %s2583_s30  }
   0x4   : > { %s2039_s15 = sadd.s32 1, %s1955_s12   ;;  %s223_s16 = sadd.s32 1, %s1951_s11 }
   0x5   : > { %s220_s17 = ssub.s32 %s1955_s12, %s2039_s15  ;;  %p233_p0 = scmp.ne.s32.totalorder %s1951_s11, %s1947_s10 }
   0x6   : > { %p221_p1 = scmp.eq.s32.totalorder %s220_s17, 0  ;;  %p234_p2 = scmp.eq.s32.totalorder %s2035_s13, 1 }
   0x7   : > { %p239_p3 = scmp.ne.s32.totalorder %s1947_s10, %s1943_s30  ;;  %p240_p4 = scmp.eq.s32.totalorder %s1563_s14, 1 }
   0x8   : > { %s2050_s18 = scalar_select %p221_p1, %s1951_s11, %s223_s16  }
   0x9   : > { %p2052_p5 = por %p234_p2, %p233_p0  ;;  %p2056_p6 = por %p240_p4, %p239_p3 }
   0xa   : > { %p1566_p7 = scmp.ge.s32.totalorder %s1955_s12, 1  ;;  %p290_p8 = scmp.lt.s32.totalorder %s1955_s12, 3 }
   0xc   : > { %p291_p9 = pnand %p1566_p7, %p290_p8 }
   0xd   : > { %v1862_v0 = vld [vmem:[%s2568_s1] sm:$0xff] (!%p291_p9)   ;;  %p326_p10 = scmp.lt.s32.totalorder (!%p291_p9), %s2035_s13, 1  ;;  %v1863_v1 = vld [vmem:[%s2568_s1 + $0x8] sm:$0xff] (!%p291_p9)   ;;  %vm383_vm0 = vcmask (!%p291_p9), 261120   ;;  %vm565_vm1 = vcmask (!%p291_p9), 1040384   ;;  %v1957_v8 = vmov (!%p291_p9), 0  }
   0xe   : > { %294 = sbr.rel (%p291_p9) target bundleno = 936 (0x3a8), region = 56  ;;  %1737 = vmatprep.subr.bf16.mxu0 (!%p291_p9), %v1862_v0  ;;  %v1868_v6 = vld [vmem:[%s2570_s3 + $0x80] sm:$0xff] (!%p291_p9)   ;;  %v1869_v7 = vld [vmem:[%s2570_s3 + $0x88] sm:$0xff] (!%p291_p9)   ;;  %vm566_vm2 = vsmask.f32 (!%p291_p9), 256  ;;  %v496_v9 = vrot.slane (!%p291_p9), %v1957_v8, 7 }
   0xf   : > { %1738 = vmatpush3.bf16.msra.mxu0 (!%p291_p9), %v1862_v0  ;;  %vm2092_vm3 = vmand (!%p291_p9), %vm565_vm1, %vm566_vm2  ;;  %vm577_vm4 = vcmask (!%p291_p9), 1044480   ;;  %vm578_vm5 = vsmask.f32 (!%p291_p9), 4352  ;;  %vm589_vm7 = vsmask.f32 (!%p291_p9), 7424  ;;  %v1870_v36 = vld [vmem:[%s2570_s3 + $0x40] sm:$0xff] (!%p291_p9)  }
  0x10   : > { %1739 = vmatprep.subr.bf16.mxu0 (!%p291_p9), %v1863_v1  ;;  %vm2096_vm6 = vmand (!%p291_p9), %vm577_vm4, %vm578_vm5  ;;  %v568_v12 = vsel (!%p291_p9), %vm2092_vm3, 0, %v496_v9  ;;  %v1570_v19 = vld [vmem:[%s2569_s2] ss:$0 sm:$0xff] (!%p291_p9)  ;;  %1651 = vmatprep.subr.bf16.mxu1 (!%p291_p9), %v1870_v36  ;;  %v1872_v58 = vld [vmem:[%s2570_s3 + $0x48] sm:$0xff] (!%p291_p9)   ;;  %vm683_vm8 = vcmask (!%p291_p9), 1046528   ;;  %s1958_s21 = smov (!%p291_p9), 96  }
  0x11   : > { %v2104_v13 = vsel (!%p291_p9), %vm2096_vm6, %v568_v12, 0  ;;  %v1871_v37 = vld [vmem:[%s2570_s3] sm:$0xff] (!%p291_p9)   ;;  %v1873_v59 = vld [vmem:[%s2570_s3 + $0x8] sm:$0xff] (!%p291_p9)   ;;  %s1959_s22 = smov (!%p291_p9), 64   ;;  %s1960_s17 = smov (!%p291_p9), 32   ;;  %v1883_v11 = vld [vmem:[%s2570_s3 + $0x30] sm:$0xff] (!%p291_p9)  }
  0x12   : > { %v593_v14 = vshll.u32 (!%p291_p9), %v2104_v13, 16  ;;  %v591_v15 = vshrl.u32 (!%p291_p9), %v2104_v13, 16  ;;  %1652 = vmatpush3.bf16.msra.mxu1 (!%p291_p9), %v1871_v37  ;;  %v1876_v37 = vld [vmem:[%s2570_s3 + $0x58] sm:$0xff] (!%p291_p9)   ;;  %v1880_v10 = vld [vmem:[%s2570_s3 + $0x68] sm:$0xff] (!%p291_p9)   ;;  %vm804_vm9 = vcmask (!%p291_p9), 523264   ;;  %vm821_vm10 = vcmask (!%p291_p9), 785408  }
  0x13   : > { %1740 = vmatpush3.bf16.msra.mxu0 (!%p291_p9), %v1863_v1  ;;  %1653 = vmatprep.subr.bf16.mxu1 (!%p291_p9), %v1872_v58  ;;  %s323_s23 = sand.u32 (!%p291_p9), 1, %s1947_s10  }
  0x14   : > { %1749 = vmatprep.subr.bf16.mxu0 (!%p291_p9), %v1868_v6  ;;  %v2108_v16 = vrot.slane (!%p291_p9), %v593_v14, 1  ;;  %s1567_s24 = sshll.u32 (!%p291_p9), %s323_s23, 6 }
  0x15   : > { %s327_s25 = scalar_select %p326_p10, %s2035_s13, 1 }
  0x16   : > { %v2111_v17 = vor.u32 %v2108_v16, %v591_v15  ;;  %1654 = vmatpush3.bf16.msra.mxu1 %v1873_v59 }
  0x17   : > { %s1635_s26 = sshll.u32 %s327_s25, 5  ;;  %s1644_s25 = sshll.u32 %s2035_s13, 10 }
  0x18   : > { %s2073_s29 = scalar_lea.vmem %s2567_s0, %s1635_s26  ;;  %v2116_v18 = vsel %vm589_vm7, %v2111_v17, %v2108_v16  ;;  %s2520_s14 = scalar_lea.hbm %s2576_s9, %s1644_s25 }
  0x19   : > { %v1864_v2 = vld [vmem:[%s2073_s29] sm:$0xff]   ;;  %v1865_v3 = vld [vmem:[%s2073_s29 + $0x8] sm:$0xff]   ;;  %v1866_v4 = vld [vmem:[%s2073_s29 + $0x10] sm:$0xff]   ;;  %s2526_s13 = scalar_lea.sflag [#allocation3], %s323_s23 }
  0x1a   : > { %1741 = vmatprep.mubr.msk.bf16.mxu0 %vm383_vm0, %v1864_v2  ;;  %v2082_v5 = vld [vmem:[%s2073_s29 + $0x18] sm:$0xff]  }
  0x1b   : > { %1742 = vmatmul.mubr.msk.bf16.vlgmr.msra.gmra.mrb[0].mxu0 %vm383_vm0, %v1865_v3 }
  0x1c   : > { %1745 = vmatprep.mubr.msk.bf16.mxu0 %vm383_vm0, %v1866_v4  ;;  %1750 = vmatpush3.bf16.msra.mxu0 %v1868_v6 }
  0x1d   : > { %1751 = vmatprep.subr.bf16.mxu0 %v1869_v7 }
  0x20   : > { %1752 = vmatpush3.bf16.msra.mxu0 %v1869_v7 }
  0x23   : > { %1746 = vmatmul.mubr.msk.bf16.gmra.mrb[4].mxu0 %vm383_vm0, %v2082_v5 }
  0xee   : > { %v1743_v20 = vpop.f32.mrb[0].mxu0 }
  0xef   : > { %v439_v21 = vadd.f32 %v1743_v20, %v1570_v19  ;;  %v430_v22 = vpop.f32.mrb[1].mxu0  ;;  %v1875_v20 = vld [vmem:[%s2570_s3 + $0x10] sm:$0xff]  }
  0xf0   : > { %v431_v23 = vadd.f32 %v1570_v19, %v430_v22  ;;  %v1744_v24 = vpop.f32.mrb[2].mxu0 }
  0xf1   : > { %v463_v25 = vmax.f32 %v439_v21, 0.0  ;;  %v442_v26 = vadd.f32 %v1744_v24, %v1570_v19  ;;  %v433_v27 = vpop.f32.mrb[3].mxu0 }
  0xf2   : > { %v461_v28 = vmax.f32 %v431_v23, 0.0  ;;  %v434_v29 = vadd.f32 %v1570_v19, %v433_v27 }
  0xf3   : > { %v1638_v30 = vpack.c.bf16 %v463_v25, %v463_v25  ;;  %v464_v31 = vmax.f32 %v442_v26, 0.0 }
  0xf4   : > { %v1636_v32 = vpack.c.bf16 %v461_v28, %v461_v28  ;;  %v462_v33 = vmax.f32 %v434_v29, 0.0 }
  0xf5   : > { %v515_v34 = vshrl.u32 %v1638_v30, 16  ;;  %v1639_v35 = vpack.c.bf16 %v464_v31, %v464_v31  ;;  %v518_v38 = vshll.u32 %v1638_v30, 16 }
  0xf6   : > { %v501_v39 = vshrl.u32 %v1636_v32, 16  ;;  %v504_v40 = vshll.u32 %v1636_v32, 16  ;;  %v1637_v41 = vpack.c.bf16 %v462_v33, %v462_v33  ;;  %v1747_v42 = vpop.f32.mrb[4].mxu0 }
  0xf7   : > { %v517_v43 = vrot.slane %v515_v34, 7  ;;  %v522_v44 = vshrl.u32 %v1639_v35, 16  ;;  %v525_v45 = vshll.u32 %v1639_v35, 16  ;;  %v455_v46 = vadd.f32 %v1747_v42, %v1570_v19  ;;  %v446_v47 = vpop.f32.mrb[5].mxu0 }
  0xf8   : > { %v503_v48 = vrot.slane %v501_v39, 7  ;;  %v508_v49 = vshrl.u32 %v1637_v41, 16  ;;  %v511_v50 = vshll.u32 %v1637_v41, 16  ;;  %v447_v51 = vadd.f32 %v1570_v19, %v446_v47  ;;  %v1748_v52 = vpop.f32.mrb[6].mxu0 }
  0xf9   : > { %v520_v53 = vor.u32 %v518_v38, %v517_v43  ;;  %v524_v54 = vrot.slane %v522_v44, 7  ;;  %v467_v55 = vmax.f32 %v455_v46, 0.0  ;;  %v458_v56 = vadd.f32 %v1748_v52, %v1570_v19  ;;  %v449_v57 = vpop.f32.mrb[7].mxu0  ;;  %v1877_v38 = vld [vmem:[%s2570_s3 + $0x18] sm:$0xff]  }
  0xfa   : > { %v506_v60 = vor.u32 %v504_v40, %v503_v48  ;;  %v510_v61 = vrot.slane %v508_v49, 7  ;;  %v465_v62 = vmax.f32 %v447_v51, 0.0  ;;  %v450_v63 = vadd.f32 %v1570_v19, %v449_v57  ;;  %v1874_v19 = vld [vmem:[%s2570_s3 + $0x50] sm:$0xff]  }
  0xfb   : > { %v571_v0 = vsel %vm2092_vm3, 0, %v520_v53  ;;  %v527_v1 = vor.u32 %v525_v45, %v524_v54  ;;  %v1642_v2 = vpack.c.bf16 %v467_v55, %v467_v55  ;;  %v468_v3 = vmax.f32 %v458_v56, 0.0  ;;  %1655 = vmatprep.subr.bf16.mxu1 %v1874_v19  ;;  %v1878_v55 = vld [vmem:[%s2570_s3 + $0x60] sm:$0xff]  }
  0xfc   : > { %v513_v4 = vor.u32 %v511_v50, %v510_v61  ;;  %v1640_v6 = vpack.c.bf16 %v465_v62, %v465_v62  ;;  %v2137_v7 = vsel %vm2096_vm6, %v571_v0, 0  ;;  %v466_v8 = vmax.f32 %v450_v63, 0.0  ;;  %1656 = vmatpush3.bf16.msra.mxu1 %v1875_v20  ;;  %v1879_v56 = vld [vmem:[%s2570_s3 + $0x20] sm:$0xff]  }
  0xfd   : > { %v572_v9 = vsel %vm2092_vm3, 0, %v527_v1  ;;  %v543_v12 = vshrl.u32 %v1642_v2, 16  ;;  %v546_v14 = vshll.u32 %v1642_v2, 16  ;;  %v1643_v15 = vpack.c.bf16 %v468_v3, %v468_v3  ;;  %721 = vrot.lane.b32.xlu1 %v2137_v7, %s1958_s21  ;;  %756 = vrot.lane.b32.xlu0 %v2137_v7, %s1959_s22  ;;  %v1881_v2 = vld [vmem:[%s2570_s3 + $0x28] sm:$0xff]  }
  0xfe   : > { %v570_v21 = vsel %vm2092_vm3, 0, %v513_v4  ;;  %v529_v22 = vshrl.u32 %v1640_v6, 16  ;;  %v532_v23 = vshll.u32 %v1640_v6, 16  ;;  %v1641_v24 = vpack.c.bf16 %v466_v8, %v466_v8  ;;  %1657 = vmatprep.subr.bf16.mxu1 %v1876_v37 }
  0xff   : > { %v2155_v25 = vsel %vm2096_vm6, %v570_v21, 0  ;;  %v545_v26 = vrot.slane %v543_v12, 7  ;;  %v550_v27 = vshrl.u32 %v1643_v15, 16  ;;  %v553_v28 = vshll.u32 %v1643_v15, 16 }
 0x100   : > { %v531_v29 = vrot.slane %v529_v22, 7  ;;  %v536_v30 = vshrl.u32 %v1641_v24, 16  ;;  %v539_v31 = vshll.u32 %v1641_v24, 16  ;;  %v2159_v32 = vsel %vm2096_vm6, %v572_v9, 0  ;;  %1658 = vmatpush3.bf16.msra.mxu1 %v1877_v38  ;;  %v1884_v22 = vld [vmem:[%s2570_s3 + $0x78] sm:$0xff]  }
 0x101   : > { %v548_v33 = vor.u32 %v546_v14, %v545_v26  ;;  %v552_v34 = vrot.slane %v550_v27, 7  ;;  %758 = vrot.lane.b32.xlu0 %v2159_v32, %s1959_s22  ;;  %v569_v35 = vsel %vm2092_vm3, 0, %v506_v60  ;;  %v687_v36 = vrot.slane %v2155_v25, 1  ;;  %1659 = vmatprep.subr.bf16.mxu1 %v1878_v55  ;;  %v1882_v14 = vld [vmem:[%s2570_s3 + $0x70] sm:$0xff]  }
 0x102   : > { %v534_v39 = vor.u32 %v532_v23, %v531_v29  ;;  %v538_v40 = vrot.slane %v536_v30, 7  ;;  %v2174_v41 = vsel %vm2096_vm6, %v569_v35, 0  ;;  %v689_v42 = vrot.slane %v2137_v7, 1  ;;  %v1885_v23 = vld [vmem:[%s2570_s3 + $0x38] sm:$0xff]  }
 0x103   : > { %v575_v43 = vsel %vm2092_vm3, 0, %v548_v33  ;;  %717 = vrot.lane.b32.xlu1 %v2174_v41, %s1958_s21  ;;  %v691_v44 = vrot.slane %v2159_v32, 1  ;;  %v555_v46 = vor.u32 %v553_v28, %v552_v34  ;;  %v598_v54 = vshll.u32 %v2174_v41, 16 }
 0x104   : > { %v573_v45 = vsel %vm2092_vm3, 0, %v534_v39  ;;  %v541_v47 = vor.u32 %v539_v31, %v538_v40  ;;  %v2185_v48 = vsel %vm683_vm8, %v687_v36, %v689_v42  ;;  %v2196_v51 = vsel %vm2096_vm6, %v575_v43, 0  ;;  %1660 = vmatpush3.bf16.msra.mxu1 %v1879_v56 }
 0x105   : > { %v2189_v49 = vsel %vm2096_vm6, %v573_v45, 0  ;;  %1753 = vmatprep.mubr.msk.bf16.mxu0 %vm383_vm0, %v2185_v48  ;;  %v692_v50 = vsel %vm683_vm8, %v689_v42, %v691_v44  ;;  %v685_v58 = vrot.slane %v2174_v41, 1  ;;  %v576_v59 = vsel %vm2092_vm3, 0, %v555_v46  ;;  %1661 = vmatprep.subr.bf16.mxu1 %v1880_v10 }
 0x106   : > { %v574_v52 = vsel %vm2092_vm3, 0, %v541_v47  ;;  %1754 = vmatmul.mubr.msk.bf16.vlgmr.msra.gmra.mrb[8].mxu0 %vm383_vm0, %v692_v50  ;;  %742 = vrot.lane.b32.xlu0 %v692_v50, %s1960_s17  ;;  %v693_v53 = vrot.slane %v2189_v49, 1  ;;  %v600_v63 = vrot.slane %v598_v54, 1  ;;  %v614_v0 = vshll.u32 %v2137_v7, 16 }
 0x107   : > { %v2212_v57 = vsel %vm2096_vm6, %v574_v52, 0  ;;  %723 = vrot.lane.b32.xlu1 %v2159_v32, %s1958_s21  ;;  %v688_v62 = vsel %vm683_vm8, %v685_v58, %v687_v36  ;;  %v697_v1 = vrot.slane %v2196_v51, 1  ;;  %v2242_v4 = vsel %vm2096_vm6, %v576_v59, 0 }
 0x108   : > { %v2220_v60 = vsel %vm683_vm8, %v691_v44, %v693_v53  ;;  %v695_v61 = vrot.slane %v2212_v57, 1  ;;  %v601_v8 = vsel %vm589_vm7, %v2111_v17, %v600_v63  ;;  %v616_v9 = vrot.slane %v614_v0, 1  ;;  %1662 = vmatpush3.bf16.msra.mxu1 %v1881_v2 }
 0x109   : > { %1757 = vmatprep.mubr.msk.bf16.mxu0 %vm383_vm0, %v2220_v60  ;;  %v622_v12 = vshll.u32 %v2159_v32, 16  ;;  %v684_v15 = vrot.slane %v2104_v13, 1  ;;  %v618_v17 = vshrl.u32 %v2137_v7, 16  ;;  %v699_v19 = vrot.slane %v2242_v4, 1  ;;  %1663 = vmatprep.subr.bf16.mxu1 %v1882_v14 }
 0x10a   : > { %738 = vrot.lane.b32.xlu0 %v688_v62, %s1960_s17  ;;  %v2238_v3 = vsel %vm683_vm8, %v693_v53, %v695_v61  ;;  %v2245_v6 = vsel %vm683_vm8, %v695_v61, %v697_v1  ;;  %v606_v29 = vshll.u32 %v2155_v25, 16  ;;  %v610_v31 = vshrl.u32 %v2155_v25, 16 }
 0x10b   : > { %754 = vrot.lane.b32.xlu1 %v2155_v25, %s1959_s22  ;;  %v620_v20 = vor.u32 %v618_v17, %v616_v9  ;;  %v624_v21 = vrot.slane %v622_v12, 1  ;;  %v686_v24 = vsel %vm683_vm8, %v684_v15, %v685_v58  ;;  %v2277_v26 = vsel %vm683_vm8, %v697_v1, %v699_v19 }
 0x10c   : > { %1664 = vmatpush3.bf16.msra.mxu1 %v1883_v11  ;;  %v2280_v27 = vsel %vm683_vm8, %v699_v19, %v684_v15  ;;  %v608_v30 = vrot.slane %v606_v29, 1  ;;  %v602_v34 = vshrl.u32 %v2174_v41, 16  ;;  %v630_v37 = vshll.u32 %v2189_v49, 16 }
 0x10d   : > { %1665 = vmatprep.subr.bf16.mxu1 %v1884_v22  ;;  %v2283_v28 = vsel %vm589_vm7, %v620_v20, %v624_v21  ;;  %v626_v39 = vshrl.u32 %v2159_v32, 16  ;;  %v634_v44 = vshrl.u32 %v2189_v49, 16  ;;  %v646_v45 = vshll.u32 %v2196_v51, 16 }
 0x10e   : > { %658 = vrot.lane.b32.xlu0 %v601_v8, %s1960_s17  ;;  %1758 = vmatmul.mubr.msk.bf16.gmra.mrb[12].mxu0 %vm383_vm0, %v2238_v3  ;;  %v612_v33 = vor.u32 %v610_v31, %v608_v30  ;;  %v604_v36 = vor.u32 %v602_v34, %v600_v63  ;;  %v632_v40 = vrot.slane %v630_v37, 1  ;;  %v638_v46 = vshll.u32 %v2212_v57, 16 }
 0x10f   : > { %719 = vrot.lane.b32.xlu1 %v2155_v25, %s1958_s21  ;;  %1761 = vmatprep.mubr.msk.bf16.mxu0 %vm383_vm0, %v2245_v6  ;;  %v628_v42 = vor.u32 %v626_v39, %v624_v21  ;;  %v654_v53 = vshll.u32 %v2242_v4, 16  ;;  %v642_v56 = vshrl.u32 %v2212_v57, 16 }
 0x110   : > { %1666 = vmatpush3.bf16.msra.mxu1 %v1885_v23  ;;  %v2304_v35 = vsel %vm589_vm7, %v612_v33, %v616_v9  ;;  %v2312_v38 = vsel %vm589_vm7, %v604_v36, %v608_v30  ;;  %v636_v47 = vor.u32 %v634_v44, %v632_v40  ;;  %v640_v52 = vrot.slane %v638_v46, 1 }
 0x111   : > { %v2324_v43 = vsel %vm589_vm7, %v628_v42, %v632_v40  ;;  %v656_v58 = vrot.slane %v654_v53, 1 }
 0x112   : > { %740 = vrot.lane.b32.xlu0 %v2185_v48, %s1960_s17  ;;  %v2344_v54 = vsel %vm589_vm7, %v636_v47, %v640_v52 }
 0x113   : > { %701 = vrot.lane.b32.xlu1 %v686_v24, %s1959_s22 }
 0x116   : > { %773 = vrot.lane.b32.xlu0 %v2283_v28, %s1958_s21  ;;  %1762 = vmatmul.mubr.msk.bf16.gmra.mrb[16].mxu0 %vm383_vm0, %v2277_v26 }
 0x117   : > { %707 = vrot.lane.b32.xlu1 %v692_v50, %s1959_s22  ;;  %1765 = vmatprep.mubr.msk.bf16.mxu0 %vm383_vm0, %v2280_v27  ;;  %v650_v50 = vshrl.u32 %v2196_v51, 16 }
 0x11a   : > { %764 = vrot.lane.b32.xlu0 %v2196_v51, %s1959_s22 }
 0x11b   : > { %703 = vrot.lane.b32.xlu1 %v688_v62, %s1959_s22  ;;  %v733_v62 = vshrl.u32 %v2242_v4, 16 }
 0x11d   : > { %v735_v63 = vor.u32 %v733_v62, %v656_v58 }
 0x11e   : > { %760 = vrot.lane.b32.xlu0 %v2189_v49, %s1959_s22  ;;  %1766 = vmatmul.mubr.msk.bf16.gmra.mrb[20].mxu0 %vm383_vm0, %v684_v15 }
 0x11f   : > { %705 = vrot.lane.b32.xlu1 %v2185_v48, %s1959_s22  ;;  %v648_v48 = vrot.slane %v646_v45, 1  ;;  %v2376_v0 = vsel %vm589_vm7, %v735_v63, %v2108_v16 }
 0x121   : > { %v652_v55 = vor.u32 %v650_v50, %v648_v48 }
 0x122   : > { %771 = vrot.lane.b32.xlu0 %v2304_v35, %s1958_s21 }
 0x123   : > { %664 = vrot.lane.b32.xlu1 %v2283_v28, %s1960_s17  ;;  %v2352_v59 = vsel %vm589_vm7, %v652_v55, %v656_v58 }
 0x126   : > { %762 = vrot.lane.b32.xlu0 %v2212_v57, %s1959_s22 }
 0x127   : > { %660 = vrot.lane.b32.xlu1 %v2312_v38, %s1960_s17 }
 0x12a   : > { %744 = vrot.lane.b32.xlu0 %v2220_v60, %s1960_s17 }
 0x12b   : > { %725 = vrot.lane.b32.xlu1 %v2189_v49, %s1958_s21 }
 0x12e   : > { %775 = vrot.lane.b32.xlu0 %v2324_v43, %s1958_s21 }
 0x12f   : > { %662 = vrot.lane.b32.xlu1 %v2304_v35, %s1960_s17 }
 0x132   : > { %746 = vrot.lane.b32.xlu0 %v2238_v3, %s1960_s17 }
 0x133   : > { %709 = vrot.lane.b32.xlu1 %v2220_v60, %s1959_s22  ;;  %v644_v60 = vor.u32 %v642_v56, %v640_v52 }
 0x135   : > { %v2359_v61 = vsel %vm589_vm7, %v644_v60, %v648_v48 }
 0x136   : > { %748 = vrot.lane.b32.xlu0 %v2245_v6, %s1960_s17 }
 0x137   : > { %666 = vrot.lane.b32.xlu1 %v2324_v43, %s1960_s17 }
 0x13a   : > { %777 = vrot.lane.b32.xlu0 %v2344_v54, %s1958_s21 }
 0x13b   : > { %711 = vrot.lane.b32.xlu1 %v2238_v3, %s1959_s22 }
 0x13e   : > { %781 = vrot.lane.b32.xlu0 %v2352_v59, %s1958_s21 }
 0x13f   : > { %727 = vrot.lane.b32.xlu1 %v2212_v57, %s1958_s21 }
 0x142   : > { %779 = vrot.lane.b32.xlu0 %v2359_v61, %s1958_s21 }
 0x143   : > { %668 = vrot.lane.b32.xlu1 %v2344_v54, %s1960_s17 }
 0x146   : > { %750 = vrot.lane.b32.xlu0 %v2277_v26, %s1960_s17 }
 0x147   : > { %713 = vrot.lane.b32.xlu1 %v2245_v6, %s1959_s22 }
 0x14a   : > { %766 = vrot.lane.b32.xlu0 %v2242_v4, %s1959_s22 }
 0x14b   : > { %729 = vrot.lane.b32.xlu1 %v2196_v51, %s1958_s21 }
 0x14e   : > { %783 = vrot.lane.b32.xlu0 %v2376_v0, %s1958_s21 }
 0x14f   : > { %670 = vrot.lane.b32.xlu1 %v2359_v61, %s1960_s17 }
 0x152   : > { %752 = vrot.lane.b32.xlu0 %v2280_v27, %s1960_s17 }
 0x153   : > { %672 = vrot.lane.b32.xlu1 %v2352_v59, %s1960_s17 }
 0x156   : > { %768 = vrot.lane.b32.xlu0 %v2104_v13, %s1959_s22 }
 0x157   : > { %715 = vrot.lane.b32.xlu1 %v2277_v26, %s1959_s22 }
 0x15a   : > { %785 = vrot.lane.b32.xlu0 %v2116_v18, %s1958_s21 }
 0x15b   : > { %731 = vrot.lane.b32.xlu1 %v2242_v4, %s1958_s21  ;;  %s1961_s21 = smov [#allocation2]  }
 0x15c   : > { %s1897_s22 = sshll.u32 %s1961_s21, 4  ;;  %s1898_s22 = int_to_ptr.vmem [resolvable:$false] %s1897_s22 }
 0x15d   : > { %s1899_s17 = scalar_lea.vmem %s1898_s22, 2048 }
 0x16f   : > { %v722_v16 = vpop.permute.xlu1 %721  ;;  %v757_v1 = vpop.permute.xlu0 %756 }
 0x173   : > { %v759_v10 = vpop.permute.xlu0 %758 }
 0x175   : > { %v718_v2 = vpop.permute.xlu1 %717 }
 0x178   : > { %v743_v3 = vpop.permute.xlu0 %742 }
 0x179   : > { %v724_v6 = vpop.permute.xlu1 %723  ;;  %v854_v40 = vsel %vm383_vm0, %v2283_v28, %v743_v3 }
 0x17a   : > { %v875_v46 = vsel %vm804_vm9, %v854_v40, %v759_v10 }
 0x17c   : > { %v739_v8 = vpop.permute.xlu0 %738 }
 0x17d   : > { %v755_v9 = vpop.permute.xlu1 %754  ;;  %v848_v4 = vsel %vm383_vm0, %v2312_v38, %v739_v8 }
 0x17e   : > { %v871_v29 = vsel %vm804_vm9, %v848_v4, %v755_v9 }
 0x180   : > { %v659_v12 = vpop.permute.xlu0 %658 }
 0x181   : > { %v720_v14 = vpop.permute.xlu1 %719  ;;  %v789_v23 = vsel %vm383_vm0, %v2104_v13, %v659_v12 }
 0x184   : > { %v741_v11 = vpop.permute.xlu0 %740 }
 0x185   : > { %v702_v15 = vpop.permute.xlu1 %701  ;;  %v851_v26 = vsel %vm383_vm0, %v2304_v35, %v741_v11 }
 0x186   : > { %v806_v24 = vsel %vm804_vm9, %v789_v23, %v702_v15  ;;  %v873_v34 = vsel %vm804_vm9, %v851_v26, %v757_v1 }
 0x187   : > { %v823_v33 = vsel %vm821_vm10, %v806_v24, %v718_v2 }
 0x188   : > { %v774_v17 = vpop.permute.xlu0 %773 }
 0x189   : > { %v708_v19 = vpop.permute.xlu1 %707  ;;  %v890_v13 = vsel %vm821_vm10, %v873_v34, %v774_v17 }
 0x18c   : > { %v2394_v20 = vpop.permute.xlu0 %764 }
 0x18d   : > { %v704_v18 = vpop.permute.xlu1 %703 }
 0x190   : > { %v761_v21 = vpop.permute.xlu0 %760 }
 0x191   : > { %v706_v22 = vpop.permute.xlu1 %705 }
 0x194   : > { %v772_v27 = vpop.permute.xlu0 %771 }
 0x195   : > { %v665_v30 = vpop.permute.xlu1 %664  ;;  %v887_v31 = vsel %vm821_vm10, %v871_v29, %v772_v27 }
 0x196   : > { %1117 = vmatprep.mubr.bf16.mxu1 %v887_v31  ;;  %v795_v55 = vsel %vm383_vm0, %v2137_v7, %v665_v30 }
 0x197   : > { %1118 = vmatmul.mubr.bf16.vlgmr.msra.gmra.mrb[0].mxu1 %v823_v33  ;;  %v812_v62 = vsel %vm804_vm9, %v795_v55, %v708_v19  ;;  %v1887_v55 = vld [vmem:[%s2572_s5 + $0x8] sm:$0xff]  }
 0x198   : > { %1124 = vmatprep.mubr.bf16.mxu1 %v890_v13  ;;  %v763_v36 = vpop.permute.xlu0 %762 }
 0x199   : > { %v661_v37 = vpop.permute.xlu1 %660 }
 0x19a   : > { %v791_v35 = vsel %vm383_vm0, %v2174_v41, %v661_v37 }
 0x19b   : > { %v808_v38 = vsel %vm804_vm9, %v791_v35, %v704_v18 }
 0x19c   : > { %v745_v39 = vpop.permute.xlu0 %744  ;;  %v826_v44 = vsel %vm821_vm10, %v808_v38, %v720_v14 }
 0x19d   : > { %v726_v42 = vpop.permute.xlu1 %725  ;;  %v857_v58 = vsel %vm383_vm0, %v2324_v43, %v745_v39 }
 0x19f   : > { %1125 = vmatmul.mubr.bf16.gmra.mrb[4].mxu1 %v826_v44 }
 0x1a0   : > { %v776_v45 = vpop.permute.xlu0 %775 }
 0x1a1   : > { %v663_v47 = vpop.permute.xlu1 %662  ;;  %v893_v48 = vsel %vm821_vm10, %v875_v46, %v776_v45 }
 0x1a2   : > { %v793_v50 = vsel %vm383_vm0, %v2155_v25, %v663_v47  ;;  %1131 = vmatprep.mubr.bf16.mxu1 %v893_v48  ;;  %v877_v25 = vsel %vm804_vm9, %v857_v58, %v761_v21 }
 0x1a3   : > { %v810_v41 = vsel %vm804_vm9, %v793_v50, %v706_v22 }
 0x1a4   : > { %v747_v52 = vpop.permute.xlu0 %746  ;;  %v829_v28 = vsel %vm821_vm10, %v810_v41, %v722_v16  ;;  %v832_v16 = vsel %vm821_vm10, %v812_v62, %v724_v6 }
 0x1a5   : > { %v710_v53 = vpop.permute.xlu1 %709  ;;  %v860_v43 = vsel %vm383_vm0, %v2344_v54, %v747_v52 }
 0x1a6   : > { %v879_v14 = vsel %vm804_vm9, %v860_v43, %v763_v36 }
 0x1a7   : > { %1132 = vmatmul.mubr.bf16.gmra.mrb[8].mxu1 %v829_v28  ;;  %v1886_v28 = vld [vmem:[%s2572_s5] sm:$0xff]  }
 0x1a8   : > { %v749_v56 = vpop.permute.xlu0 %748  ;;  %1769 = vmatprep.subr.bf16.mxu0 %v1886_v28 }
 0x1a9   : > { %v667_v60 = vpop.permute.xlu1 %666  ;;  %v863_v8 = vsel %vm383_vm0, %v2359_v61, %v749_v56  ;;  %1770 = vmatpush3.bf16.msra.mxu0 %v1886_v28 }
 0x1aa   : > { %v797_v7 = vsel %vm383_vm0, %v2159_v32, %v667_v60  ;;  %v881_v32 = vsel %vm804_vm9, %v863_v8, %v2394_v20  ;;  %1771 = vmatprep.subr.bf16.mxu0 %v1887_v55 }
 0x1ab   : > { %v814_v9 = vsel %vm804_vm9, %v797_v7, %v710_v53 }
 0x1ac   : > { %v778_v63 = vpop.permute.xlu0 %777  ;;  %v835_v15 = vsel %vm821_vm10, %v814_v9, %v726_v42 }
 0x1ad   : > { %v712_v1 = vpop.permute.xlu1 %711  ;;  %v896_v10 = vsel %vm821_vm10, %v877_v25, %v778_v63  ;;  %1772 = vmatpush3.bf16.msra.mxu0 %v1887_v55  ;;  %v1888_v63 = vld [vmem:[%s2574_s7] sm:$0xff]  }
 0x1ae   : > { %1138 = vmatprep.mubr.bf16.mxu1 %v896_v10  ;;  %1781 = vmatprep.subr.bf16.mxu0 %v1888_v63 }
 0x1af   : > { %1139 = vmatmul.mubr.bf16.gmra.mrb[12].mxu1 %v832_v16 }
 0x1b0   : > { %v782_v2 = vpop.permute.xlu0 %781 }
 0x1b1   : > { %v728_v3 = vpop.permute.xlu1 %727  ;;  %v902_v54 = vsel %vm821_vm10, %v881_v32, %v782_v2 }
 0x1b4   : > { %v780_v12 = vpop.permute.xlu0 %779 }
 0x1b5   : > { %v669_v11 = vpop.permute.xlu1 %668  ;;  %v899_v6 = vsel %vm821_vm10, %v879_v14, %v780_v12 }
 0x1b6   : > { %1145 = vmatprep.mubr.bf16.mxu1 %v899_v6  ;;  %v799_v61 = vsel %vm383_vm0, %v2189_v49, %v669_v11 }
 0x1b7   : > { %1146 = vmatmul.mubr.bf16.gmra.mrb[16].mxu1 %v835_v15  ;;  %v816_v18 = vsel %vm804_vm9, %v799_v61, %v712_v1  ;;  %v2479_v1 = vld [vmem:[%s2571_s4] ss:$0 sm:$0xff] }
 0x1b8   : > { %1152 = vmatprep.mubr.bf16.mxu1 %v902_v54  ;;  %v751_v17 = vpop.permute.xlu0 %750  ;;  %v838_v22 = vsel %vm821_vm10, %v816_v18, %v728_v3 }
 0x1b9   : > { %v714_v19 = vpop.permute.xlu1 %713  ;;  %v866_v23 = vsel %vm383_vm0, %v2352_v59, %v751_v17 }
 0x1bc   : > { %v767_v21 = vpop.permute.xlu0 %766 }
 0x1bd   : > { %v730_v4 = vpop.permute.xlu1 %729  ;;  %v883_v20 = vsel %vm804_vm9, %v866_v23, %v767_v21 }
 0x1bf   : > { %1153 = vmatmul.mubr.bf16.gmra.mrb[20].mxu1 %v838_v22 }
 0x1c0   : > { %v784_v24 = vpop.permute.xlu0 %783 }
 0x1c1   : > { %v671_v26 = vpop.permute.xlu1 %670  ;;  %v905_v27 = vsel %vm821_vm10, %v883_v20, %v784_v24 }
 0x1c2   : > { %v801_v49 = vsel %vm383_vm0, %v2212_v57, %v671_v26  ;;  %1159 = vmatprep.mubr.bf16.mxu1 %v905_v27 }
 0x1c3   : > { %v818_v29 = vsel %vm804_vm9, %v801_v49, %v714_v19 }
 0x1c4   : > { %v753_v30 = vpop.permute.xlu0 %752  ;;  %v841_v33 = vsel %vm821_vm10, %v818_v29, %v730_v4 }
 0x1c5   : > { %v673_v31 = vpop.permute.xlu1 %672  ;;  %v869_v13 = vsel %vm383_vm0, %v2376_v0, %v753_v30 }
 0x1c6   : > { %v803_v36 = vsel %vm383_vm0, %v2196_v51, %v673_v31 }
 0x1c7   : > { %1160 = vmatmul.mubr.bf16.gmra.mrb[24].mxu1 %v841_v33 }
 0x1c8   : > { %v769_v34 = vpop.permute.xlu0 %768 }
 0x1c9   : > { %v716_v59 = vpop.permute.xlu1 %715  ;;  %v885_v37 = vsel %vm804_vm9, %v869_v13, %v769_v34 }
 0x1ca   : > { %v820_v57 = vsel %vm804_vm9, %v803_v36, %v716_v59 }
 0x1cc   : > { %v786_v35 = vpop.permute.xlu0 %785 }
 0x1cd   : > { %v732_v38 = vpop.permute.xlu1 %731  ;;  %v908_v39 = vsel %vm821_vm10, %v885_v37, %v786_v35  ;;  %v1889_v35 = vld [vmem:[%s2574_s7 + $0x8] sm:$0xff]  }
 0x1ce   : > { %1166 = vmatprep.mubr.bf16.mxu1 %v908_v39  ;;  %v844_v40 = vsel %vm821_vm10, %v820_v57, %v732_v38 }
 0x1cf   : > { %1167 = vmatmul.mubr.bf16.gmra.mrb[28].mxu1 %v844_v40 }
 0x1d9   : > { %v1755_v42 = vpop.f32.mrb[8].mxu0 }
 0x1da   : > { %v1208_v44 = vpop.f32.mrb[9].mxu0 }
 0x1db   : > { %v1756_v45 = vpop.f32.mrb[10].mxu0 }
 0x1dc   : > { %v1211_v46 = vpop.f32.mrb[11].mxu0 }
 0x1e1   : > { %v1759_v0 = vpop.f32.mrb[12].mxu0 }
 0x1e2   : > { %v1222_v47 = vpop.f32.mrb[13].mxu0 }
 0x1e3   : > { %v1760_v48 = vpop.f32.mrb[14].mxu0 }
 0x1e4   : > { %v1225_v51 = vpop.f32.mrb[15].mxu0 }
 0x1e9   : > { %v2461_v50 = vpop.f32.mrb[16].mxu0 }
 0x1ea   : > { %v1236_v41 = vpop.f32.mrb[17].mxu0 }
 0x1eb   : > { %v1764_v52 = vpop.f32.mrb[18].mxu0 }
 0x1ec   : > { %v1239_v53 = vpop.f32.mrb[19].mxu0 }
 0x1f1   : > { %v2469_v56 = vpop.f32.mrb[20].mxu0 }
 0x1f2   : > { %v2471_v58 = vpop.f32.mrb[21].mxu0 }
 0x1f3   : > { %v1768_v60 = vpop.f32.mrb[22].mxu0 }
 0x1f4   : > { %v1253_v62 = vpop.f32.mrb[23].mxu0 }
 0x26a   : > { %v1667_v25 = vpop.f32.mrb[0].mxu1 }
 0x26b   : > { %v1668_v10 = vpop.f32.mrb[1].mxu1 }
 0x26c   : > { %v1669_v16 = vadd.f32 %v1668_v10, %v1667_v25  ;;  %v1670_v7 = vpop.f32.mrb[2].mxu1 }
 0x26d   : > { %v1671_v2 = vpop.f32.mrb[3].mxu1 }
 0x26e   : > { %v1120_v43 = vadd.f32 %v1669_v16, %v2479_v1 }
 0x270   : > { %v1209_v3 = vadd.f32 %v1208_v44, %v1120_v43 }
 0x272   : > { %v1673_v8 = vpop.f32.mrb[4].mxu1  ;;  %v1263_v32 = vmax.f32 %v1209_v3, 0.0 }
 0x273   : > { %v1674_v9 = vpop.f32.mrb[5].mxu1 }
 0x274   : > { %v1675_v12 = vadd.f32 %v1674_v9, %v1673_v8  ;;  %v1676_v14 = vpop.f32.mrb[6].mxu1 }
 0x275   : > { %v1677_v11 = vpop.f32.mrb[7].mxu1  ;;  %v1892_v14 = vld [vmem:[%s2073_s29 + $0x10] sm:$0xff]  }
 0x276   : > { %v1127_v6 = vadd.f32 %v1675_v12, %v2479_v1  ;;  %v1890_v12 = vld [vmem:[%s2073_s29] sm:$0xff]  }
 0x278   : > { %v1216_v15 = vadd.f32 %v1755_v42, %v1127_v6 }
 0x27a   : > { %v1264_v54 = vmax.f32 %v1216_v15, 0.0  ;;  %v1679_v61 = vpop.f32.mrb[8].mxu1 }
 0x27b   : > { %v1680_v17 = vpop.f32.mrb[9].mxu1 }
 0x27c   : > { %v1271_v19 = vpack.c.bf16 %v1264_v54, %v1263_v32  ;;  %v1681_v18 = vadd.f32 %v1680_v17, %v1679_v61  ;;  %v1682_v21 = vpop.f32.mrb[10].mxu1 }
 0x27d   : > { %v1683_v4 = vpop.f32.mrb[11].mxu1 }
 0x27e   : > { %v1134_v22 = vadd.f32 %v1681_v18, %v2479_v1  ;;  %1773 = vmatprep.mubr.msk.bf16.mxu0 %vm383_vm0, %v1271_v19 }
 0x280   : > { %v1223_v23 = vadd.f32 %v1222_v47, %v1134_v22 }
 0x282   : > { %v1685_v20 = vpop.f32.mrb[12].mxu1  ;;  %v1265_v31 = vmax.f32 %v1223_v23, 0.0 }
 0x283   : > { %v1686_v24 = vpop.f32.mrb[13].mxu1 }
 0x284   : > { %v1687_v26 = vadd.f32 %v1686_v24, %v1685_v20  ;;  %v1688_v27 = vpop.f32.mrb[14].mxu1 }
 0x285   : > { %v1689_v49 = vpop.f32.mrb[15].mxu1 }
 0x286   : > { %v1141_v29 = vadd.f32 %v1687_v26, %v2479_v1 }
 0x288   : > { %v1230_v30 = vadd.f32 %v1759_v0, %v1141_v29 }
 0x28a   : > { %v1266_v33 = vmax.f32 %v1230_v30, 0.0  ;;  %v1691_v34 = vpop.f32.mrb[16].mxu1 }
 0x28b   : > { %v1692_v59 = vpop.f32.mrb[17].mxu1 }
 0x28c   : > { %v1272_v13 = vpack.c.bf16 %v1266_v33, %v1265_v31  ;;  %v1693_v36 = vadd.f32 %v1692_v59, %v1691_v34  ;;  %v1694_v37 = vpop.f32.mrb[18].mxu1 }
 0x28d   : > { %v1695_v57 = vpop.f32.mrb[19].mxu1 }
 0x28e   : > { %v1148_v38 = vadd.f32 %v1693_v36, %v2479_v1  ;;  %1774 = vmatmul.mubr.msk.bf16.vlgmr.msra.gmra.mrb[24].mxu0 %vm383_vm0, %v1272_v13 }
 0x28f   : > { %1782 = vmatpush3.bf16.msra.mxu0 %v1888_v63 }
 0x290   : > { %v1237_v39 = vadd.f32 %v1236_v41, %v1148_v38  ;;  %1783 = vmatprep.subr.bf16.mxu0 %v1889_v35 }
 0x292   : > { %v1697_v40 = vpop.f32.mrb[20].mxu1  ;;  %v1267_v48 = vmax.f32 %v1237_v39, 0.0 }
 0x293   : > { %v1698_v42 = vpop.f32.mrb[21].mxu1  ;;  %1784 = vmatpush3.bf16.msra.mxu0 %v1889_v35 }
 0x294   : > { %v1699_v44 = vadd.f32 %v1698_v42, %v1697_v40  ;;  %v1700_v45 = vpop.f32.mrb[22].mxu1 }
 0x295   : > { %v1701_v46 = vpop.f32.mrb[23].mxu1 }
 0x296   : > { %v1155_v0 = vadd.f32 %v1699_v44, %v2479_v1 }
 0x298   : > { %v1244_v47 = vadd.f32 %v2461_v50, %v1155_v0 }
 0x29a   : > { %v1268_v51 = vmax.f32 %v1244_v47, 0.0  ;;  %v1703_v52 = vpop.f32.mrb[24].mxu1 }
 0x29b   : > { %v1704_v53 = vpop.f32.mrb[25].mxu1 }
 0x29c   : > { %v1273_v28 = vpack.c.bf16 %v1268_v51, %v1267_v48  ;;  %v1705_v55 = vadd.f32 %v1704_v53, %v1703_v52  ;;  %v1706_v60 = vpop.f32.mrb[26].mxu1 }
 0x29d   : > { %v1707_v41 = vpop.f32.mrb[27].mxu1 }
 0x29e   : > { %1777 = vmatprep.mubr.msk.bf16.mxu0 %vm383_vm0, %v1273_v28  ;;  %v1162_v62 = vadd.f32 %v1705_v55, %v2479_v1 }
 0x2a0   : > { %v1251_v63 = vadd.f32 %v2471_v58, %v1162_v62  ;;  %v1891_v58 = vld [vmem:[%s2073_s29 + $0x8] sm:$0xff]   ;;  %s325_s29 = scalar_lea.vmem [#allocation2], %s1567_s24 }
 0x2a1   : > { %s1501_s26 = sshll.u32 %s325_s29, 4  ;;  %s2522_s26 = int_to_ptr.vmem [resolvable:$true] %s1501_s26 }
 0x2a2   : > { %v1709_v25 = vpop.f32.mrb[28].mxu1  ;;  %v1269_v3 = vmax.f32 %v1251_v63, 0.0  ;;  %s1893_s16 = scalar_lea.vmem %s2522_s26, 1024  ;;  %p1900_p0 = scmp.lt.s32.totalorder %s2522_s26, %s1898_s22 }
 0x2a3   : > { %v1710_v10 = vpop.f32.mrb[29].mxu1  ;;  %p1894_p11 = scmp.ne.s32.totalorder %s2522_s26, %s1893_s16  ;;  %p1901_p1 = scmp.lt.s32.totalorder %s1899_s17, %s1893_s16 }
 0x2a4   : > { %v1711_v50 = vadd.f32 %v1710_v10, %v1709_v25  ;;  %v1712_v16 = vpop.f32.mrb[30].mxu1 }
 0x2a5   : > { %v1713_v7 = vpop.f32.mrb[31].mxu1  ;;  %p1895_p12 = pnand %p1894_p11, %p2052_p5  ;;  %p1902_p2 = por %p1901_p1, %p1900_p0 }
 0x2a6   : > { %v1169_v2 = vadd.f32 %v1711_v50, %v2479_v1  ;;  %v1623_v1 = vld [vmem:[%s2575_s8] ss:$0 sm:$0xff] }
 0x2a7   : > { %p1896_p13 = pneg %p1895_p12 }
 0x2a8   : > { %v1258_v43 = vadd.f32 %v2469_v56, %v1169_v2  ;;  %v1616_v56 = vld [vmem:[%s2573_s6] ss:$0 sm:$0xff] }
 0x2a9   : > { %v1799_v11 = vadd.f32 %v1623_v1, %v1616_v56  ;;  %p1903_p3 = pnand %p1902_p2, %p1896_p13 }
 0x2aa   : > { %v1270_v8 = vmax.f32 %v1258_v43, 0.0 }
 0x2ac   : > { %v1274_v9 = vpack.c.bf16 %v1270_v8, %v1269_v3 }
 0x2ae   : > { %1778 = vmatmul.mubr.msk.bf16.gmra.mrb[28].mxu0 %vm383_vm0, %v1274_v9 }
 0x2af   : > { %1785 = vmatprep.mubr.msk.bf16.mxu0 %vm383_vm0, %v1890_v12 }
 0x2b6   : > { %1786 = vmatmul.mubr.msk.bf16.vlgmr.msra.gmra.mrb[24].mxu0 %vm383_vm0, %v1891_v58 }
 0x2b7   : > { %1789 = vmatprep.mubr.msk.bf16.mxu0 %vm383_vm0, %v1892_v14 }
 0x2be   : > { %1790 = vmatmul.mubr.msk.bf16.gmra.mrb[28].mxu0 %vm383_vm0, %v2082_v5 }
 0x389   : > { %v1787_v6 = vpop.f32.mrb[24].mxu0 }
 0x38a   : > { %v1793_v15 = vadd.f32 %v1787_v6, %v1616_v56  ;;  %v1432_v32 = vpop.f32.mrb[25].mxu0 }
 0x38b   : > { %v1795_v54 = vadd.f32 %v1616_v56, %v1432_v32  ;;  %v1788_v61 = vpop.f32.mrb[26].mxu0 }
 0x38c   : > { %v1794_v17 = vadd.f32 %v1793_v15, %v1623_v1  ;;  %v1798_v19 = vadd.f32 %v1799_v11, %v1788_v61  ;;  %v1435_v5 = vpop.f32.mrb[27].mxu0 }
 0x38d   : > { %v1796_v18 = vadd.f32 %v1795_v54, %v1623_v1  ;;  %v1800_v21 = vadd.f32 %v1799_v11, %v1435_v5 }
 0x38e   : > { %v1473_v4 = vmax.f32 %v1794_v17, 0.0  ;;  %v1474_v22 = vmax.f32 %v1798_v19, 0.0 }
 0x38f   : > { %v1471_v23 = vmax.f32 %v1796_v18, 0.0  ;;  %v1472_v20 = vmax.f32 %v1800_v21, 0.0 }
 0x390   : > { %1481 = vst [vmem:[%s325_s29 + $0x10] sm:$0xff] %v1473_v4  ;;  %1482 = vst [vmem:[%s325_s29 + $0x18] sm:$0xff] %v1474_v22 }
 0x391   : > { %1479 = vst [vmem:[%s325_s29] sm:$0xff] %v1471_v23  ;;  %1480 = vst [vmem:[%s325_s29 + $0x8] sm:$0xff] %v1472_v20  ;;  %v1791_v24 = vpop.f32.mrb[28].mxu0 }
 0x392   : > { %v1802_v26 = vadd.f32 %v1799_v11, %v1791_v24  ;;  %v1448_v27 = vpop.f32.mrb[29].mxu0 }
 0x393   : > { %v1804_v49 = vadd.f32 %v1799_v11, %v1448_v27  ;;  %v1792_v29 = vpop.f32.mrb[30].mxu0 }
 0x394   : > { %v1477_v30 = vmax.f32 %v1802_v26, 0.0  ;;  %v1806_v31 = vadd.f32 %v1799_v11, %v1792_v29  ;;  %v1451_v33 = vpop.f32.mrb[31].mxu0 }
 0x395   : > { %v1475_v34 = vmax.f32 %v1804_v49, 0.0  ;;  %v1808_v59 = vadd.f32 %v1799_v11, %v1451_v33 }
 0x396   : > { %1485 = vst [vmem:[%s325_s29 + $0x30] sm:$0xff] %v1477_v30  ;;  %v1478_v13 = vmax.f32 %v1806_v31, 0.0 }
 0x397   : > { %1483 = vst [vmem:[%s325_s29 + $0x20] sm:$0xff] %v1475_v34  ;;  %v1476_v36 = vmax.f32 %v1808_v59, 0.0 }
 0x398   : > { %1486 = vst [vmem:[%s325_s29 + $0x38] sm:$0xff] %v1478_v13 }
 0x399   : > { %1484 = vst [vmem:[%s325_s29 + $0x28] sm:$0xff] %v1476_v36 }
 0x39a   : > { %1906 = shalt.err (!%p1903_p3)
}
 0x39b   : > { %s1907_s23 = scalar_lea.hbm %s2520_s14, 1024  ;;  %s1911_s25 = scalar_lea.hbm %s2576_s9, 2048 }
 0x39c   : > { %p1908_p4 = scmp.ne.s32.totalorder %s2520_s14, %s1907_s23  ;;  %p1912_p9 = scmp.lt.u32.totalorder %s2520_s14, %s2576_s9 }
 0x39d   : > { %p1913_p10 = scmp.lt.u32.totalorder %s1911_s25, %s1907_s23  ;;  %p1915_p12 = scmp.lt.u32.totalorder %s1907_s23, %s2520_s14 }
 0x39e   : > { %p1909_p7 = pnand %p1908_p4, %p2052_p5 }
 0x39f   : > { %p1914_p11 = por %p1913_p10, %p1912_p9 }
 0x3a0   : > { %p1910_p8 = pneg %p1909_p7 }
 0x3a1   : > { %p1916_p13 = por %p1915_p12, %p1914_p11 }
 0x3a3   : > { %p1917_p0 = pnand %p1916_p13, %p1910_p8 }
 0x3a5   : > { %1920 = shalt.err (!%p1917_p0)
}
 0x3a6   : > { %s1962_s16 = smov 128   ;;  %s1963_s21 = smov 8  }
 0x3a7   : > { %1817 = dma.vmem_to_hbm [thread:$0]  (%p2052_p5), %s2522_s26, 1024, %s2520_s14, %s2526_s13, %s1962_s16, %s1962_s16, %s1963_s21  }
 0x3a8 PF: > { %p1823_p1 = scmp.ge.s32.totalorder %s1955_s12, 2  ;;  %s1516_s22 = sand.u32 1, %s1943_s30  }
 0x3a9   : > { %s1517_s17 = scalar_lea.sflag [#allocation3], %s1516_s22 }
 0x3aa   : > { %p1820_p2 = pnand %p1823_p1, %p2056_p6 }
 0x3ac   : > { %1938 = dma.done.wait (!%p1820_p2), %s1517_s17, 1024  }
 0x3ad   : > { %1940 = vsyncadd (!%p1820_p2), %s1517_s17, 4294966272  ;;  %p19_p3 = scmp.ge.s32.totalorder %s2039_s15, 4   ;;  %s2583_s30 = smov %s1947_s10 }
 0x3ae   : > { %s2584_s10 = smov %s1951_s11  ;;  %s2585_s11 = smov %s2050_s18 }
 0x3af   : > { %s2586_s12 = smov %s2039_s15  ;;  %21 = sbr.rel (!%p19_p3) target bundleno = 3 (0x3), region = 91 }
 0x3b6   :  { %1522 = vsyncpa [#allocation3], 1 }
 0x3b7   :  { %1524 = vsyncpa [#allocation3 + $0x1], 1 }

</bundles_post_ra>
